<compile_context>
chip_gen: v6e
topology: v6e:2x2x1
jax: 0.10.0
libtpu: 0.0.40
codegen_flags: <defaults>
</compile_context>

<pallas_src>
import functools

import jax
import jax.numpy as jnp
import numpy as np
from jax import lax
from jax.experimental import pallas as pl
from jax.experimental.pallas import tpu as pltpu

_LOG_2PI = float(np.log(2.0 * np.pi))


def _nf_loss_kernel(x_ref, e_ref, t_ref, part_ref, *, batch, tile_b):
    """One batch tile of the fused flow-forward + prior log-prob partial reduction.

    x_ref    : (TB, Dp)    data tile (native dtype, upcast here)
    e_ref    : (1, Dp)     exp(log_scale), precomputed in the wrapper (VMEM resident)
    t_ref    : (1, Dp)     shift of the diagonal affine flow      (VMEM resident)
    part_ref : (1, 8, 128) lane-dense slab holding this tile's partial 0.5*sum(y^2)
                           (broadcast; wrapper reads [:, 0, 0])
    """
    i = pl.program_id(0)

    x = x_ref[...].astype(jnp.float32)           # (TB, Dp)
    e = e_ref[...]                                # (1, Dp) f32
    t = t_ref[...]                                # (1, Dp) f32

    # flow forward: y = x * exp(s) + t   (broadcast over batch rows)
    y = x * e + t                                 # (TB, Dp)

    # Row-level reduce first (XLU), then mask padded batch rows on the tiny
    # (TB, 1) result instead of per element.
    row_sums = jnp.sum(y * y, axis=1, keepdims=True)               # (TB, 1)
    row = i * tile_b + lax.broadcasted_iota(jnp.int32, (tile_b, 1), 0)
    row_sums = jnp.where(row < batch, row_sums, 0.0)

    partial = 0.5 * jnp.sum(row_sums)

    # Lane-dense, unmasked store of the per-tile partial.
    part_ref[...] = jnp.broadcast_to(partial, (1, 8, 128)).astype(jnp.float32)


def _vmem_capacity_bytes():
    try:
        return int(pltpu.get_tpu_info().vmem_capacity_bytes)
    except Exception:
        return 64 * 1024 * 1024   # conservative (v7x per-core) fallback


def _sublane_multiple(itemsize):
    # f32 -> 8, bf16/f16 -> 16, int8/fp8 -> 32
    return max(8, 32 // int(itemsize))


def _choose_tile_b(b, d_pad, itemsize, sub_mult, vmem_cap):
    """Batch tile sized from VMEM capacity; aligned; >=2 grid steps when possible."""
    per_buf = (12 << 20) if vmem_cap <= (64 << 20) else (16 << 20)
    tb = per_buf // (d_pad * itemsize)
    tb = max(sub_mult, (tb // sub_mult) * sub_mult)

    b_sub = ((b + sub_mult - 1) // sub_mult) * sub_mult
    tb = min(tb, b_sub)

    # Keep at least 2 grid steps when the batch allows, so a 'parallel' grid axis
    # actually feeds both v7x TensorCores (costs ~0.35us extra step elsewhere).
    if b_sub >= 2 * sub_mult:
        half = max(sub_mult, ((b_sub // 2) // sub_mult) * sub_mult)
        tb = min(tb, half)

    return max(sub_mult, (tb // sub_mult) * sub_mult)


def nf_model_forward(x_nchw, log_scale, shift, *, tile_b=None):
    """Wrapper mimicking NFModel.forward(x)['loss'].

    x_nchw    : (B, C, H, W)  data (float32 or bfloat16)
    log_scale : (D,) float    flow parameter   (D = C*H*W)
    shift     : (D,) float    flow parameter
    returns   : scalar loss (float32)
    """
    b = x_nchw.shape[0]
    d = int(np.prod(x_nchw.shape[1:]))
    x_flat = x_nchw.reshape(b, d)                 # keep native dtype (bf16 OK)
    itemsize = x_flat.dtype.itemsize
    sub_mult = _sublane_multiple(itemsize)

    # Lane-align the feature axis; zero-padded columns contribute exactly 0.
    d_pad = ((d + 127) // 128) * 128

    vmem_cap = _vmem_capacity_bytes()
    if tile_b is None:
        tb = _choose_tile_b(b, d_pad, itemsize, sub_mult, vmem_cap)
    else:
        tb = max(sub_mult, (int(tile_b) // sub_mult) * sub_mult)

    num_tiles = -(-b // tb)
    b_pad = num_tiles * tb

    # One-time O(D) parameter transforms hoisted out of the streaming loop.
    s_f32 = log_scale.astype(jnp.float32).reshape(d)
    e2d = jnp.exp(s_f32)[None, :]                 # (1, D)
    t2d = shift.astype(jnp.float32).reshape(1, d)
    if d_pad != d:
        e2d = jnp.pad(e2d, ((0, 0), (0, d_pad - d)))
        t2d = jnp.pad(t2d, ((0, 0), (0, d_pad - d)))
    if b_pad != b or d_pad != d:
        x_flat = jnp.pad(x_flat, ((0, b_pad - b), (0, d_pad - d)))

    kernel = functools.partial(_nf_loss_kernel, batch=b, tile_b=tb)

    # VMEM budget: double-buffered x window + resident params + out + headroom,
    # capped per generation (64-MiB parts get a tighter cap).
    x_window = 2 * tb * d_pad * itemsize
    needed = x_window + 4 * d_pad * 4 + 2 * 8 * 128 * 4 + (8 << 20)
    cap = (40 << 20) if vmem_cap <= (64 << 20) else (64 << 20)
    vmem_limit = int(min(cap, max(32 << 20, needed)))

    cost = pl.CostEstimate(
        flops=4 * b_pad * d_pad,                  # mul, add, square, reduce-add
        transcendentals=0,                        # exp() hoisted to the wrapper
        bytes_accessed=b_pad * d_pad * itemsize + 2 * d_pad * 4
        + num_tiles * 8 * 128 * 4,
    )

    partials = pl.pallas_call(
        kernel,
        out_shape=jax.ShapeDtypeStruct((num_tiles, 8, 128), jnp.float32),
        grid_spec=pltpu.PrefetchScalarGridSpec(
            num_scalar_prefetch=0,
            grid=(num_tiles,),
            in_specs=[
                pl.BlockSpec((tb, d_pad), lambda i: (i, 0)),   # streamed batch tiles
                pl.BlockSpec((1, d_pad), lambda i: (0, 0)),    # resident (no re-DMA)
                pl.BlockSpec((1, d_pad), lambda i: (0, 0)),    # resident (no re-DMA)
            ],
            out_specs=pl.BlockSpec((1, 8, 128), lambda i: (i, 0, 0)),
        ),
        compiler_params=pltpu.CompilerParams(
            dimension_semantics=("parallel",),                 # megacore-shardable
            vmem_limit_bytes=vmem_limit,
        ),
        cost_estimate=cost,
    )(x_flat, e2d, t2d)

    # Tiny final combine of per-tile partials plus the analytic constants:
    #   + 0.5 * B * D * log(2*pi)   (prior normalization)
    #   - B * sum(s)                (log|det J|, identical for every sample)
    const = 0.5 * b * d * _LOG_2PI - b * jnp.sum(s_f32)
    return jnp.sum(partials[:, 0, 0]) + const


def _reference_forward(x_nchw, log_scale, shift):
    """Pure-JAX reference for correctness checking."""
    b = x_nchw.shape[0]
    d = int(np.prod(x_nchw.shape[1:]))
    x_flat = x_nchw.reshape(b, d).astype(jnp.float32)
    y = x_flat * jnp.exp(log_scale.astype(jnp.float32)) + shift.astype(jnp.float32)
    log_prob_prior = -0.5 * jnp.sum(y * y, axis=1) - 0.5 * d * jnp.log(2.0 * jnp.pi)
    log_abs_det_jac = jnp.sum(log_scale.astype(jnp.float32))
    return -jnp.sum(log_prob_prior + log_abs_det_jac)


if __name__ == "__main__":
    key = jax.random.PRNGKey(0)
    k_x, k_s, k_t, k_x2, k_x3 = jax.random.split(key, 5)

    # input_dim = (C, H, W) = (4, 16, 16), D = 1024
    B, C, H, W = 2, 4, 16, 16
    D = C * H * W

    x = jax.random.normal(k_x, (B, C, H, W), dtype=jnp.float32)
    log_scale = 0.05 * jax.random.normal(k_s, (D,), dtype=jnp.float32)
    shift = 0.1 * jax.random.normal(k_t, (D,), dtype=jnp.float32)

    loss = jax.block_until_ready(nf_model_forward(x, log_scale, shift))
    ref = _reference_forward(x, log_scale, shift)
    np.testing.assert_allclose(np.asarray(loss), np.asarray(ref), rtol=1e-4, atol=1e-2)

    # Multi-tile + batch-row-padding path (forced small tile to exercise the grid).
    B2 = 20
    x2 = jax.random.normal(k_x2, (B2, C, H, W), dtype=jnp.float32)
    loss2 = jax.block_until_ready(nf_model_forward(x2, log_scale, shift, tile_b=8))
    ref2 = _reference_forward(x2, log_scale, shift)
    np.testing.assert_allclose(np.asarray(loss2), np.asarray(ref2), rtol=1e-4, atol=1e-2)

    # bf16 input + non-lane-aligned D (column padding + 16-row sublane tile) path.
    B3, C3, H3, W3 = 10, 3, 14, 14
    D3 = C3 * H3 * W3
    x3 = jax.random.normal(k_x3, (B3, C3, H3, W3), dtype=jnp.float32).astype(jnp.bfloat16)
    log_scale3 = 0.05 * jax.random.normal(k_s, (D3,), dtype=jnp.float32)
    shift3 = 0.1 * jax.random.normal(k_t, (D3,), dtype=jnp.float32)
    loss3 = jax.block_until_ready(nf_model_forward(x3, log_scale3, shift3))
    ref3 = _reference_forward(x3, log_scale3, shift3)
    np.testing.assert_allclose(np.asarray(loss3), np.asarray(ref3), rtol=2e-3, atol=0.5)

    print("KERNEL_OK")
</pallas_src>

<mosaic_0001>
module attributes {stable_mosaic.version = 11 : i64} {
  func.func @_nf_loss_kernel(%arg0: i32, %arg1: memref<8x1024xf32, #tpu.memory_space<vmem>>, %arg2: memref<1x1024xf32, #tpu.memory_space<vmem>>, %arg3: memref<1x1024xf32, #tpu.memory_space<vmem>>, %arg4: memref<1x8x128xf32, #tpu.memory_space<vmem>>) attributes {dimension_semantics = [#tpu.dimension_semantics<parallel>], iteration_bounds = array<i64: 1>, scalar_prefetch = 0 : i64, scratch_operands = 0 : i64, tpu.core_type = #tpu.core_type<tc>, window_params = [{transform_indices = @transform_0, window_bounds = array<i64: 8, 1024>}, {pipeline_mode = #tpu.pipeline_mode<synchronous>, transform_indices = @transform_1, window_bounds = array<i64: 1, 1024>}, {pipeline_mode = #tpu.pipeline_mode<synchronous>, transform_indices = @transform_2, window_bounds = array<i64: 1, 1024>}, {transform_indices = @transform_3, window_bounds = array<i64: 1, 8, 128>}]} {
    %c0 = arith.constant 0 : index
    %c0_0 = arith.constant 0 : index
    %0 = vector.load %arg1[%c0, %c0_0] : memref<8x1024xf32, #tpu.memory_space<vmem>>, vector<8x1024xf32>
    %c0_1 = arith.constant 0 : index
    %c0_2 = arith.constant 0 : index
    %1 = vector.load %arg2[%c0_1, %c0_2] : memref<1x1024xf32, #tpu.memory_space<vmem>>, vector<1x1024xf32>
    %c0_3 = arith.constant 0 : index
    %c0_4 = arith.constant 0 : index
    %2 = vector.load %arg3[%c0_3, %c0_4] : memref<1x1024xf32, #tpu.memory_space<vmem>>, vector<1x1024xf32>
    %3 = vector.broadcast %1 : vector<1x1024xf32> to vector<8x1024xf32>
    %4 = arith.mulf %0, %3 : vector<8x1024xf32>
    %5 = vector.broadcast %2 : vector<1x1024xf32> to vector<8x1024xf32>
    %6 = arith.addf %4, %5 : vector<8x1024xf32>
    %7 = arith.mulf %6, %6 : vector<8x1024xf32>
    %cst = arith.constant dense<0.000000e+00> : vector<8xf32>
    %8 = vector.multi_reduction <add>, %7, %cst [1] : vector<8x1024xf32> to vector<8xf32>
    %9 = vector.shape_cast %8 : vector<8xf32> to vector<8x1xf32>
    %c8_i32 = arith.constant 8 : i32
    %10 = arith.muli %arg0, %c8_i32 : i32
    %11 = tpu.iota {dimensions = array<i32: 0>} : vector<8x1xi32>
    %12 = vector.broadcast %10 : i32 to vector<8x1xi32>
    %13 = arith.addi %12, %11 : vector<8x1xi32>
    %c2_i32 = arith.constant 2 : i32
    %14 = vector.broadcast %c2_i32 : i32 to vector<8x1xi32>
    %15 = arith.cmpi slt, %13, %14 : vector<8x1xi32>
    %cst_5 = arith.constant 0.000000e+00 : f32
    %16 = vector.broadcast %cst_5 : f32 to vector<8x1xf32>
    %17 = arith.select %15, %9, %16 : vector<8x1xi1>, vector<8x1xf32>
    %18 = vector.shape_cast %17 : vector<8x1xf32> to vector<1x8x1xf32>
    %cst_6 = arith.constant dense<0.000000e+00> : vector<1xf32>
    %19 = vector.multi_reduction <add>, %18, %cst_6 [1, 2] : vector<1x8x1xf32> to vector<1xf32>
    %20 = vector.shape_cast %19 : vector<1xf32> to vector<1x1x1xf32>
    %21 = vector.extract %20[0, 0, 0] : f32 from vector<1x1x1xf32>
    %cst_7 = arith.constant 5.000000e-01 : f32
    %22 = arith.mulf %cst_7, %21 : f32
    %23 = vector.broadcast %22 : f32 to vector<1x8x128xf32>
    %c0_8 = arith.constant 0 : index
    %c0_9 = arith.constant 0 : index
    %c0_10 = arith.constant 0 : index
    %24 = vector.load %arg4[%c0_8, %c0_9, %c0_10] : memref<1x8x128xf32, #tpu.memory_space<vmem>>, vector<1x8x128xf32>
    tpu.vector_store %arg4[%c0_8, %c0_9, %c0_10], %23 {strides = array<i32>} : memref<1x8x128xf32, #tpu.memory_space<vmem>>, vector<1x8x128xf32>,
    return
  }
  func.func @transform_0(%arg0: i32) -> (i32, i32) {
    %c0_i32 = arith.constant 0 : i32
    %c0_i32_0 = arith.constant 0 : i32
    return %arg0, %c0_i32 : i32, i32
  }
  func.func @transform_1(%arg0: i32) -> (i32, i32) {
    %c0_i32 = arith.constant 0 : i32
    %c0_i32_0 = arith.constant 0 : i32
    %c0_i32_1 = arith.constant 0 : i32
    return %c0_i32, %c0_i32_0 : i32, i32
  }
  func.func @transform_2(%arg0: i32) -> (i32, i32) {
    %c0_i32 = arith.constant 0 : i32
    %c0_i32_0 = arith.constant 0 : i32
    %c0_i32_1 = arith.constant 0 : i32
    return %c0_i32, %c0_i32_0 : i32, i32
  }
  func.func @transform_3(%arg0: i32) -> (i32, i32, i32) {
    %c0_i32 = arith.constant 0 : i32
    %c0_i32_0 = arith.constant 0 : i32
    %c0_i32_1 = arith.constant 0 : i32
    return %arg0, %c0_i32, %c0_i32_0 : i32, i32, i32
  }
}

</mosaic_0001>

<bundles_post_ra>
// kernel: tpu_custom_call.1
= control target key start
LH: loop header
LB: loop body
LE: loop exit
PB: predicated region body
PF: predicated region fallthrough
CT: control target
= control target key end

     0   :  { %8 = vsyncpa [#allocation3], 0  ;;  %s351_s0 = inlined_call_operand.hbm [shape: f32[8,1024], index: 0, kind: input, shape index: {}]   ;;  %s352_s1 = inlined_call_operand.hbm [shape: f32[1,1024], index: 1, kind: input, shape index: {}]   ;;  %s353_s2 = inlined_call_operand.hbm [shape: f32[1,1024], index: 2, kind: input, shape index: {}]   ;;  %s354_s3 = inlined_call_operand.hbm [shape: f32[1,8,128], index: 3, kind: output, shape index: {}]  }
   0x1   :  { %9 = vsyncpa [#allocation6], 0 }
   0x2   :  { %10 = vsyncpa [#allocation4], 0  ;;  %s304_s12 = smov [#allocation5]   ;;  %s305_s14 = smov [#allocation2]  }
   0x3   :  { %s27_s13 = sshll.u32 %s304_s12, 4  ;;  %s17_s15 = sshll.u32 %s305_s14, 4  ;;  %s28_s13 = int_to_ptr.vmem [resolvable:$true] %s27_s13  ;;  %s18_s15 = int_to_ptr.vmem [resolvable:$true] %s17_s15 }
   0x4   :  { %s226_s16 = scalar_lea.vmem %s28_s13, 128  ;;  %p231_p1 = scmp.lt.s32.totalorder %s28_s13, %s28_s13 }
   0x5   :  { %p227_p0 = scmp.ne.s32.totalorder %s28_s13, %s226_s16  ;;  %p232_p2 = scmp.lt.s32.totalorder %s226_s16, %s226_s16 }
   0x7   :  { %p233_p3 = por %p232_p2, %p231_p1 }
   0x9   :  { %p234_p4 = pnand %p233_p3, %p227_p0 }
   0xb   :  { %237 = shalt.err (!%p234_p4)
}
   0xc   :  { %30 = dma.hbm_to_vmem [thread:$0]  %s352_s1, 128, %s28_s13, [#allocation6]  }
   0xd   :  { %s246_s19 = scalar_lea.vmem %s18_s15, 1024  ;;  %p251_p6 = scmp.lt.s32.totalorder %s18_s15, %s18_s15 }
   0xe   :  { %p247_p5 = scmp.ne.s32.totalorder %s18_s15, %s246_s19  ;;  %p252_p7 = scmp.lt.s32.totalorder %s246_s19, %s246_s19 }
  0x10   :  { %p253_p8 = por %p252_p7, %p251_p6 }
  0x12   :  { %p254_p9 = pnand %p253_p8, %p247_p5 }
  0x14   :  { %257 = shalt.err (!%p254_p9)
}
  0x15   :  { %20 = dma.hbm_to_vmem [thread:$0]  %s351_s0, 1024, %s18_s15, [#allocation3]  }
  0x16   :  { %s306_s22 = smov [#allocation7]  }
  0x17   :  { %s37_s23 = sshll.u32 %s306_s22, 4  ;;  %s38_s23 = int_to_ptr.vmem [resolvable:$true] %s37_s23 }
  0x18   :  { %s266_s24 = scalar_lea.vmem %s38_s23, 128  ;;  %p271_p11 = scmp.lt.s32.totalorder %s38_s23, %s38_s23 }
  0x19   :  { %p267_p10 = scmp.ne.s32.totalorder %s38_s23, %s266_s24  ;;  %p272_p12 = scmp.lt.s32.totalorder %s266_s24, %s266_s24 }
  0x1b   :  { %p273_p13 = por %p272_p12, %p271_p11 }
  0x1d   :  { %p274_p0 = pnand %p273_p13, %p267_p10 }
  0x1f   :  { %277 = shalt.err (!%p274_p0)
}
  0x20   :  { %40 = dma.hbm_to_vmem [thread:$0]  %s353_s2, 128, %s38_s23, [#allocation6]  }
  0x21   :  { %298 = dma.done.wait [#allocation3], 1024  }
  0x22   :  { %299 = vsyncadd [#allocation3], 4294966272 }
  0x23   :  { %300 = dma.done.wait [#allocation6], 256  }
  0x24   :  { %301 = vsyncadd [#allocation6], 4294967040  ;;  %v61_v0 = vlaneseq  ;;  %v50_v8 = vld [vmem:[#allocation2] sm:$0xff]  ;;  %v51_v9 = vld [vmem:[#allocation2 + $0x8] sm:$0xff]  ;;  %vm182_vm1 = vcmask 7168   ;;  %s307_s0 = smov [#allocation8]  }
  0x25   :  { %v52_v10 = vld [vmem:[#allocation2 + $0x10] sm:$0xff]  ;;  %v53_v11 = vld [vmem:[#allocation2 + $0x18] sm:$0xff]  ;;  %v58_v12 = vld [vmem:[#allocation5] sm:$0xff]  ;;  %s202_s2 = sshll.u32 %s307_s0, 4  ;;  %s203_s2 = int_to_ptr.vmem [resolvable:$true] %s202_s2 }
  0x26   :  { %v337_v1 = vshrl.u32 %v61_v0, 7  ;;  %v54_v14 = vld [vmem:[#allocation2 + $0x20] sm:$0xff]  ;;  %v59_v19 = vld [vmem:[#allocation7] sm:$0xff]  ;;  %v56_v30 = vld [vmem:[#allocation2 + $0x30] sm:$0xff]  ;;  %s278_s28 = scalar_lea.vmem %s203_s2, 128  ;;  %p283_p2 = scmp.lt.s32.totalorder %s203_s2, %s203_s2 }
  0x27   :  { %v55_v23 = vld [vmem:[#allocation2 + $0x28] sm:$0xff]  ;;  %v57_v39 = vld [vmem:[#allocation2 + $0x38] sm:$0xff]  ;;  %p279_p1 = scmp.ne.s32.totalorder %s203_s2, %s278_s28  ;;  %p284_p3 = scmp.lt.s32.totalorder %s278_s28, %s278_s28 }
  0x28   :  { %v63_v2 = vsub.s32 0, %v337_v1  ;;  %v67_v3 = vsub.s32 1, %v337_v1  ;;  %v71_v4 = vsub.s32 2, %v337_v1  ;;  %v75_v5 = vsub.s32 3, %v337_v1 }
  0x29   :  { %v79_v6 = vsub.s32 4, %v337_v1  ;;  %v83_v7 = vsub.s32 5, %v337_v1  ;;  %v87_v13 = vsub.s32 6, %v337_v1  ;;  %v91_v22 = vsub.s32 7, %v337_v1  ;;  %p285_p4 = por %p284_p3, %p283_p2 }
  0x2a   :  { %v64_v15 = vrot.slane %v58_v12, %v63_v2  ;;  %v68_v16 = vrot.slane %v58_v12, %v67_v3  ;;  %v72_v17 = vrot.slane %v58_v12, %v71_v4  ;;  %v76_v18 = vrot.slane %v58_v12, %v75_v5 }
  0x2b   :  { %v80_v20 = vrot.slane %v58_v12, %v79_v6  ;;  %v84_v21 = vrot.slane %v58_v12, %v83_v7  ;;  %v88_v28 = vrot.slane %v58_v12, %v87_v13  ;;  %v113_v31 = vrot.slane %v59_v19, %v63_v2  ;;  %p286_p5 = pnand %p285_p4, %p279_p1 }
  0x2c   :  { %v101_v24 = vmul.f32 %v64_v15, %v50_v8  ;;  %v102_v25 = vmul.f32 %v68_v16, %v51_v9  ;;  %v103_v26 = vmul.f32 %v72_v17, %v52_v10  ;;  %v104_v27 = vmul.f32 %v76_v18, %v53_v11 }
  0x2d   :  { %v105_v29 = vmul.f32 %v80_v20, %v54_v14  ;;  %v117_v32 = vrot.slane %v59_v19, %v67_v3  ;;  %v121_v33 = vrot.slane %v59_v19, %v71_v4  ;;  %v125_v34 = vrot.slane %v59_v19, %v75_v5 }
  0x2e   :  { %v92_v35 = vrot.slane %v58_v12, %v91_v22  ;;  %v106_v36 = vmul.f32 %v84_v21, %v55_v23  ;;  %v129_v37 = vrot.slane %v59_v19, %v79_v6  ;;  %v133_v38 = vrot.slane %v59_v19, %v83_v7 }
  0x2f   :  { %v150_v40 = vadd.f32 %v113_v31, %v101_v24  ;;  %v151_v41 = vadd.f32 %v117_v32, %v102_v25  ;;  %v152_v42 = vadd.f32 %v121_v33, %v103_v26  ;;  %v153_v43 = vadd.f32 %v125_v34, %v104_v27 }
  0x30   :  { %v107_v44 = vmul.f32 %v88_v28, %v56_v30  ;;  %v137_v45 = vrot.slane %v59_v19, %v87_v13  ;;  %v154_v46 = vadd.f32 %v129_v37, %v105_v29  ;;  %v108_v50 = vmul.f32 %v92_v35, %v57_v39 }
  0x31   :  { %v158_v47 = vmul.f32 %v150_v40, %v150_v40  ;;  %v159_v48 = vmul.f32 %v151_v41, %v151_v41  ;;  %v160_v49 = vmul.f32 %v152_v42, %v152_v42  ;;  %v141_v51 = vrot.slane %v59_v19, %v91_v22 }
  0x32   :  { %v155_v52 = vadd.f32 %v133_v38, %v106_v36  ;;  %v161_v53 = vmul.f32 %v153_v43, %v153_v43  ;;  %v156_v55 = vadd.f32 %v137_v45, %v107_v44  ;;  %v162_v56 = vmul.f32 %v154_v46, %v154_v46 }
  0x33   :  { %v166_v54 = vadd.f32 %v159_v48, %v158_v47  ;;  %v157_v58 = vadd.f32 %v141_v51, %v108_v50  ;;  %vm180_vm0 = vcmp.lt.s32.totalorder %v337_v1, 2 }
  0x34   :  { %v163_v59 = vmul.f32 %v155_v52, %v155_v52  ;;  %v164_v61 = vmul.f32 %v156_v55, %v156_v55 }
  0x35   :  { %v167_v57 = vadd.f32 %v166_v54, %v160_v49  ;;  %v165_v63 = vmul.f32 %v157_v58, %v157_v58 }
  0x37   :  { %v168_v60 = vadd.f32 %v167_v57, %v161_v53 }
  0x39   :  { %v169_v62 = vadd.f32 %v168_v60, %v162_v56 }
  0x3b   :  { %v170_v0 = vadd.f32 %v169_v62, %v163_v59 }
  0x3d   :  { %v171_v2 = vadd.f32 %v170_v0, %v164_v61 }
  0x3f   :  { %v172_v3 = vadd.f32 %v171_v2, %v165_v63 }
  0x41   :  { %173 = vadd.xlane.f32.xlu0 %v172_v3 }
  0xca   :  { %v174_v4 = vpop.xlane.xlu0 %173 }
  0xcb   :  { %v181_v5 = vsel %vm180_vm0, %v174_v4, 0.0 }
  0xcc   :  { %v183_v6 = vsel %vm182_vm1, %v181_v5, 0.0 }
  0xcd   :  { %184 = vadd.xlane.f32.xlu0 %v183_v6 }
 0x156   :  { %v185_v7 = vpop.xlane.xlu0 %184 }
 0x157   :  { %v186_v8 = vrot.slane %v185_v7, 4 }
 0x159   :  { %v187_v9 = vadd.f32 %v186_v8, %v185_v7 }
 0x15b   :  { %v188_v10 = vrot.slane %v187_v9, 2 }
 0x15d   :  { %v189_v11 = vadd.f32 %v188_v10, %v187_v9 }
 0x15f   :  { %v190_v12 = vrot.slane %v189_v11, 1 }
 0x161   :  { %v191_v13 = vadd.f32 %v190_v12, %v189_v11 }
 0x163   :  { %212 = vpush %v191_v13 }
 0x194   :  { %s213_s26 = spop %212 }
 0x195   :  { %s193_s27 = smul.f32 0.5, %s213_s26 }
 0x197   :  { %v194_v14 = vstv %s193_s27 }
 0x198   :  { %195 = vst [vmem:[#allocation8] sm:$0xff] %v194_v14 }
 0x199   :  { %289 = shalt.err (!%p286_p5)
}
 0x19a   :  { %205 = dma.vmem_to_hbm [thread:$0]  %s203_s2, 128, %s354_s3, [#allocation4]  }
 0x19b   :  { %302 = dma.done.wait [#allocation4], 128  }
 0x19c   :  { %303 = vsyncadd [#allocation4], 4294967168 }
 0x19d   :  { %209 = vsyncpa [#allocation3], 1 }
 0x19e   :  { %210 = vsyncpa [#allocation6], 1 }
 0x19f   :  { %211 = vsyncpa [#allocation4], 1 }

</bundles_post_ra>
